<compile_context>
chip_gen: v7x
topology: tpu7x:2x2x1
jax: 0.10.0
libtpu: 0.0.40
codegen_flags: <defaults>
</compile_context>

<pallas_src>
import jax
import jax.numpy as jnp
from jax.experimental import pallas as pl
from jax.experimental.pallas import tpu as pltpu


LIN_IN = 197    # Linear in_features (the view(-1, 197))
LIN_OUT = 100   # Linear out_features
K_PAD = 256     # contraction dim padded to a multiple of 128 lanes
N_PAD = 128     # output dim padded to one full lane vreg


def fused_forward_kernel(wc_ref, xstk_ref, wl_ref, beff_ref, o_ref):
    """Commuted conv1x1 + Linear(197->100) + clamp(0,6)/6, all in one body.

    wc_ref   : (Cout*Cin,)         SMEM  flattened conv weight scalars
    xstk_ref : (Cin*rows, K_PAD)   VMEM  padded input, stacked per input channel
    wl_ref   : (K_PAD, N_PAD)      VMEM  linear weight^T, zero-padded, pre-scaled by 1/6
    beff_ref : (Cout, N_PAD)       VMEM  effective bias per output channel (already /6)
    o_ref    : (Cout*rows, N_PAD)  VMEM  output
    """
    cout = beff_ref.shape[0]
    cin = wc_ref.shape[0] // cout
    rows = xstk_ref.shape[0] // cin

    # Z = X @ Wl on the MXU: 24x256x128 MACs, f32 accumulation.  The conv
    # intermediate is never materialized; the channel mix happens on Z below.
    z = jnp.dot(xstk_ref[...], wl_ref[...], preferred_element_type=jnp.float32)

    # Per-input-channel slabs of Z in the 128-lane output space (value slices).
    zs = [z[ci * rows:(ci + 1) * rows, :] for ci in range(cin)]

    # 1x1 conv commuted past the Linear: Cout x Cin scalar FMAs on (rows,128) slabs,
    # effective bias (conv bias through the Linear + linear bias, /6) added once.
    for c in range(cout):
        acc = beff_ref[c:c + 1, :] + wc_ref[c * cin + 0] * zs[0]
        for ci in range(1, cin):
            acc = acc + wc_ref[c * cin + ci] * zs[ci]
        # clamp(y, 0, 6)/6 == clamp(y/6, 0, 1); the /6 lives in wl_ref / beff_ref.
        o_ref[c * rows:(c + 1) * rows, :] = jnp.clip(acc, 0.0, 1.0)


def model_forward(x, params):
    conv_w, conv_b, lin_w, lin_b = params
    N, Cin, H, W = x.shape
    Cout = conv_w.shape[0]
    assert N == 1, "demo supports batch 1 (matches the PyTorch driver)"
    Hp, Wp = H + 2, W + 2
    assert (Hp * Wp) % LIN_IN == 0, "conv output must flatten into rows of 197"
    rows = (Hp * Wp) // LIN_IN          # view rows contributed per out-channel (8)
    R = Cout * rows                     # total view rows (64)

    inv6 = jnp.float32(1.0 / 6.0)

    # Input layout: spatial zero-pad (conv padding=1), then per input channel lay the
    # flattened padded spatial out as (rows, 197), pad lanes to 256, stack channels on M.
    xp = jnp.pad(x, ((0, 0), (0, 0), (1, 1), (1, 1)))                    # (1,Cin,Hp,Wp)
    xstk = xp.reshape(Cin, rows, LIN_IN)                                 # batch==1
    xstk = jnp.pad(xstk, ((0, 0), (0, 0), (0, K_PAD - LIN_IN)))
    xstk = xstk.reshape(Cin * rows, K_PAD)                               # (24, 256)

    # Linear weight: transpose, zero-pad to lane-dense (256,128), fold in the /6.
    wl = jnp.pad(lin_w.T, ((0, K_PAD - LIN_IN), (0, N_PAD - LIN_OUT))) * inv6   # (256,128)

    # Effective bias per output channel: conv bias pushed through the Linear + lin bias, /6.
    col_sum = jnp.sum(wl, axis=0)                                        # (128,) pad rows are 0
    lb_pad = jnp.pad(lin_b, (0, N_PAD - LIN_OUT)) * inv6                 # (128,)
    beff = conv_b[:, None] * col_sum[None, :] + lb_pad[None, :]          # (8, 128)

    wc = conv_w.reshape(Cout * Cin)                                      # (24,) SMEM scalars

    out = pl.pallas_call(
        fused_forward_kernel,
        out_shape=jax.ShapeDtypeStruct((R, N_PAD), jnp.float32),
        in_specs=[
            pl.BlockSpec(memory_space=pltpu.MemorySpace.SMEM),           # conv w scalars
            pl.BlockSpec((Cin * rows, K_PAD), lambda: (0, 0)),           # stacked input
            pl.BlockSpec((K_PAD, N_PAD), lambda: (0, 0)),                # linear w (/6)
            pl.BlockSpec((Cout, N_PAD), lambda: (0, 0)),                 # effective bias
        ],
        out_specs=pl.BlockSpec((R, N_PAD), lambda: (0, 0)),
    )(wc, xstk, wl, beff)

    # TODO(synk): the (64,100) slice could be deferred to the consumer to save one tiny HLO.
    return out[:, :LIN_OUT]


def init_params(key):
    k1, k2, k3, k4 = jax.random.split(key, 4)
    conv_w = jax.random.normal(k1, (8, 3, 1, 1), jnp.float32) * 0.1
    conv_b = jax.random.normal(k2, (8,), jnp.float32) * 0.1
    lin_w = jax.random.normal(k3, (100, 197), jnp.float32) * 0.05
    lin_b = jax.random.normal(k4, (100,), jnp.float32) * 0.05
    return conv_w, conv_b, lin_w, lin_b


if __name__ == "__main__":
    key = jax.random.PRNGKey(0)
    kx, kp = jax.random.split(key)
    # input chosen so conv output (1, 8, 197, 8) flattens into (64, 197)
    x = jax.random.normal(kx, (1, 3, 195, 6), jnp.float32)
    params = init_params(kp)

    out = jax.jit(model_forward)(x, params)
    out = jax.block_until_ready(out)

    # plain-JAX reference of the original module semantics
    conv_w, conv_b, lin_w, lin_b = params
    xp = jnp.pad(x, ((0, 0), (0, 0), (1, 1), (1, 1)))
    v1_ref = (
        jnp.einsum("nchw,oc->nohw", xp, conv_w.reshape(8, 3))
        + conv_b[None, :, None, None]
    )
    v2_ref = jnp.clip(v1_ref.reshape(-1, 197) @ lin_w.T + lin_b, 0.0, 6.0)
    v3_ref = v2_ref / 6.0

    assert out.shape == (64, 100)
    assert jnp.max(jnp.abs(out - v3_ref)) < 1e-4

    print("KERNEL_OK")
</pallas_src>

<mosaic_0001>
module attributes {stable_mosaic.version = 11 : i64} {
  func.func @fused_forward_kernel(%arg0: memref<24xf32, #tpu.memory_space<smem>>, %arg1: memref<24x256xf32, #tpu.memory_space<vmem>>, %arg2: memref<256x128xf32, #tpu.memory_space<vmem>>, %arg3: memref<8x128xf32, #tpu.memory_space<vmem>>, %arg4: memref<64x128xf32, #tpu.memory_space<vmem>>) attributes {dimension_semantics = [], scalar_prefetch = 0 : i64, scratch_operands = 0 : i64, tpu.core_type = #tpu.core_type<tc>} {
    %c0 = arith.constant 0 : index
    %c0_0 = arith.constant 0 : index
    %0 = vector.load %arg1[%c0, %c0_0] : memref<24x256xf32, #tpu.memory_space<vmem>>, vector<24x256xf32>
    %c0_1 = arith.constant 0 : index
    %c0_2 = arith.constant 0 : index
    %1 = vector.load %arg2[%c0_1, %c0_2] : memref<256x128xf32, #tpu.memory_space<vmem>>, vector<256x128xf32>
    %cst = arith.constant dense<0.000000e+00> : vector<24x128xf32>
    %2 = tpu.matmul %0, %1, %cst {dimension_numbers = #tpu.dot_dimension_numbers<[1], [0], [0], [1], [0, 0, 1, 1], [], []>} : vector<24x256xf32>, vector<256x128xf32>, vector<24x128xf32> -> vector<24x128xf32>
    %3 = vector.extract_strided_slice %2 {offsets = [0, 0], sizes = [8, 128], strides = [1, 1]} : vector<24x128xf32> to vector<8x128xf32>
    %4 = vector.extract_strided_slice %2 {offsets = [8, 0], sizes = [8, 128], strides = [1, 1]} : vector<24x128xf32> to vector<8x128xf32>
    %5 = vector.extract_strided_slice %2 {offsets = [16, 0], sizes = [8, 128], strides = [1, 1]} : vector<24x128xf32> to vector<8x128xf32>
    %c0_3 = arith.constant 0 : index
    %c0_4 = arith.constant 0 : index
    %6 = vector.load %arg3[%c0_3, %c0_4] : memref<8x128xf32, #tpu.memory_space<vmem>>, vector<1x128xf32>
    %c0_5 = arith.constant 0 : index
    %7 = memref.load %arg0[%c0_5] : memref<24xf32, #tpu.memory_space<smem>>
    %8 = vector.broadcast %7 : f32 to vector<8x128xf32>
    %9 = arith.mulf %8, %3 : vector<8x128xf32>
    %10 = vector.broadcast %6 : vector<1x128xf32> to vector<8x128xf32>
    %11 = arith.addf %10, %9 : vector<8x128xf32>
    %c1 = arith.constant 1 : index
    %12 = memref.load %arg0[%c1] : memref<24xf32, #tpu.memory_space<smem>>
    %13 = vector.broadcast %12 : f32 to vector<8x128xf32>
    %14 = arith.mulf %13, %4 : vector<8x128xf32>
    %15 = arith.addf %11, %14 : vector<8x128xf32>
    %c2 = arith.constant 2 : index
    %16 = memref.load %arg0[%c2] : memref<24xf32, #tpu.memory_space<smem>>
    %17 = vector.broadcast %16 : f32 to vector<8x128xf32>
    %18 = arith.mulf %17, %5 : vector<8x128xf32>
    %19 = arith.addf %15, %18 : vector<8x128xf32>
    %cst_6 = arith.constant 0.000000e+00 : f32
    %cst_7 = arith.constant 1.000000e+00 : f32
    %20 = vector.broadcast %cst_6 : f32 to vector<8x128xf32>
    %21 = arith.maximumf %20, %19 : vector<8x128xf32>
    %22 = vector.broadcast %cst_7 : f32 to vector<8x128xf32>
    %23 = arith.minimumf %22, %21 : vector<8x128xf32>
    %c0_8 = arith.constant 0 : index
    %c0_9 = arith.constant 0 : index
    %24 = vector.load %arg4[%c0_8, %c0_9] : memref<64x128xf32, #tpu.memory_space<vmem>>, vector<8x128xf32>
    tpu.vector_store %arg4[%c0_8, %c0_9], %23 {strides = array<i32>} : memref<64x128xf32, #tpu.memory_space<vmem>>, vector<8x128xf32>,
    %c1_10 = arith.constant 1 : index
    %c0_11 = arith.constant 0 : index
    %25 = vector.load %arg3[%c1_10, %c0_11] : memref<8x128xf32, #tpu.memory_space<vmem>>, vector<1x128xf32>
    %c3 = arith.constant 3 : index
    %26 = memref.load %arg0[%c3] : memref<24xf32, #tpu.memory_space<smem>>
    %27 = vector.broadcast %26 : f32 to vector<8x128xf32>
    %28 = arith.mulf %27, %3 : vector<8x128xf32>
    %29 = vector.broadcast %25 : vector<1x128xf32> to vector<8x128xf32>
    %30 = arith.addf %29, %28 : vector<8x128xf32>
    %c4 = arith.constant 4 : index
    %31 = memref.load %arg0[%c4] : memref<24xf32, #tpu.memory_space<smem>>
    %32 = vector.broadcast %31 : f32 to vector<8x128xf32>
    %33 = arith.mulf %32, %4 : vector<8x128xf32>
    %34 = arith.addf %30, %33 : vector<8x128xf32>
    %c5 = arith.constant 5 : index
    %35 = memref.load %arg0[%c5] : memref<24xf32, #tpu.memory_space<smem>>
    %36 = vector.broadcast %35 : f32 to vector<8x128xf32>
    %37 = arith.mulf %36, %5 : vector<8x128xf32>
    %38 = arith.addf %34, %37 : vector<8x128xf32>
    %cst_12 = arith.constant 0.000000e+00 : f32
    %cst_13 = arith.constant 1.000000e+00 : f32
    %39 = vector.broadcast %cst_12 : f32 to vector<8x128xf32>
    %40 = arith.maximumf %39, %38 : vector<8x128xf32>
    %41 = vector.broadcast %cst_13 : f32 to vector<8x128xf32>
    %42 = arith.minimumf %41, %40 : vector<8x128xf32>
    %c8 = arith.constant 8 : index
    %c0_14 = arith.constant 0 : index
    %43 = vector.load %arg4[%c8, %c0_14] : memref<64x128xf32, #tpu.memory_space<vmem>>, vector<8x128xf32>
    tpu.vector_store %arg4[%c8, %c0_14], %42 {strides = array<i32>} : memref<64x128xf32, #tpu.memory_space<vmem>>, vector<8x128xf32>,
    %c2_15 = arith.constant 2 : index
    %c0_16 = arith.constant 0 : index
    %44 = vector.load %arg3[%c2_15, %c0_16] : memref<8x128xf32, #tpu.memory_space<vmem>>, vector<1x128xf32>
    %c6 = arith.constant 6 : index
    %45 = memref.load %arg0[%c6] : memref<24xf32, #tpu.memory_space<smem>>
    %46 = vector.broadcast %45 : f32 to vector<8x128xf32>
    %47 = arith.mulf %46, %3 : vector<8x128xf32>
    %48 = vector.broadcast %44 : vector<1x128xf32> to vector<8x128xf32>
    %49 = arith.addf %48, %47 : vector<8x128xf32>
    %c7 = arith.constant 7 : index
    %50 = memref.load %arg0[%c7] : memref<24xf32, #tpu.memory_space<smem>>
    %51 = vector.broadcast %50 : f32 to vector<8x128xf32>
    %52 = arith.mulf %51, %4 : vector<8x128xf32>
    %53 = arith.addf %49, %52 : vector<8x128xf32>
    %c8_17 = arith.constant 8 : index
    %54 = memref.load %arg0[%c8_17] : memref<24xf32, #tpu.memory_space<smem>>
    %55 = vector.broadcast %54 : f32 to vector<8x128xf32>
    %56 = arith.mulf %55, %5 : vector<8x128xf32>
    %57 = arith.addf %53, %56 : vector<8x128xf32>
    %cst_18 = arith.constant 0.000000e+00 : f32
    %cst_19 = arith.constant 1.000000e+00 : f32
    %58 = vector.broadcast %cst_18 : f32 to vector<8x128xf32>
    %59 = arith.maximumf %58, %57 : vector<8x128xf32>
    %60 = vector.broadcast %cst_19 : f32 to vector<8x128xf32>
    %61 = arith.minimumf %60, %59 : vector<8x128xf32>
    %c16 = arith.constant 16 : index
    %c0_20 = arith.constant 0 : index
    %62 = vector.load %arg4[%c16, %c0_20] : memref<64x128xf32, #tpu.memory_space<vmem>>, vector<8x128xf32>
    tpu.vector_store %arg4[%c16, %c0_20], %61 {strides = array<i32>} : memref<64x128xf32, #tpu.memory_space<vmem>>, vector<8x128xf32>,
    %c3_21 = arith.constant 3 : index
    %c0_22 = arith.constant 0 : index
    %63 = vector.load %arg3[%c3_21, %c0_22] : memref<8x128xf32, #tpu.memory_space<vmem>>, vector<1x128xf32>
    %c9 = arith.constant 9 : index
    %64 = memref.load %arg0[%c9] : memref<24xf32, #tpu.memory_space<smem>>
    %65 = vector.broadcast %64 : f32 to vector<8x128xf32>
    %66 = arith.mulf %65, %3 : vector<8x128xf32>
    %67 = vector.broadcast %63 : vector<1x128xf32> to vector<8x128xf32>
    %68 = arith.addf %67, %66 : vector<8x128xf32>
    %c10 = arith.constant 10 : index
    %69 = memref.load %arg0[%c10] : memref<24xf32, #tpu.memory_space<smem>>
    %70 = vector.broadcast %69 : f32 to vector<8x128xf32>
    %71 = arith.mulf %70, %4 : vector<8x128xf32>
    %72 = arith.addf %68, %71 : vector<8x128xf32>
    %c11 = arith.constant 11 : index
    %73 = memref.load %arg0[%c11] : memref<24xf32, #tpu.memory_space<smem>>
    %74 = vector.broadcast %73 : f32 to vector<8x128xf32>
    %75 = arith.mulf %74, %5 : vector<8x128xf32>
    %76 = arith.addf %72, %75 : vector<8x128xf32>
    %cst_23 = arith.constant 0.000000e+00 : f32
    %cst_24 = arith.constant 1.000000e+00 : f32
    %77 = vector.broadcast %cst_23 : f32 to vector<8x128xf32>
    %78 = arith.maximumf %77, %76 : vector<8x128xf32>
    %79 = vector.broadcast %cst_24 : f32 to vector<8x128xf32>
    %80 = arith.minimumf %79, %78 : vector<8x128xf32>
    %c24 = arith.constant 24 : index
    %c0_25 = arith.constant 0 : index
    %81 = vector.load %arg4[%c24, %c0_25] : memref<64x128xf32, #tpu.memory_space<vmem>>, vector<8x128xf32>
    tpu.vector_store %arg4[%c24, %c0_25], %80 {strides = array<i32>} : memref<64x128xf32, #tpu.memory_space<vmem>>, vector<8x128xf32>,
    %c4_26 = arith.constant 4 : index
    %c0_27 = arith.constant 0 : index
    %82 = vector.load %arg3[%c4_26, %c0_27] : memref<8x128xf32, #tpu.memory_space<vmem>>, vector<1x128xf32>
    %c12 = arith.constant 12 : index
    %83 = memref.load %arg0[%c12] : memref<24xf32, #tpu.memory_space<smem>>
    %84 = vector.broadcast %83 : f32 to vector<8x128xf32>
    %85 = arith.mulf %84, %3 : vector<8x128xf32>
    %86 = vector.broadcast %82 : vector<1x128xf32> to vector<8x128xf32>
    %87 = arith.addf %86, %85 : vector<8x128xf32>
    %c13 = arith.constant 13 : index
    %88 = memref.load %arg0[%c13] : memref<24xf32, #tpu.memory_space<smem>>
    %89 = vector.broadcast %88 : f32 to vector<8x128xf32>
    %90 = arith.mulf %89, %4 : vector<8x128xf32>
    %91 = arith.addf %87, %90 : vector<8x128xf32>
    %c14 = arith.constant 14 : index
    %92 = memref.load %arg0[%c14] : memref<24xf32, #tpu.memory_space<smem>>
    %93 = vector.broadcast %92 : f32 to vector<8x128xf32>
    %94 = arith.mulf %93, %5 : vector<8x128xf32>
    %95 = arith.addf %91, %94 : vector<8x128xf32>
    %cst_28 = arith.constant 0.000000e+00 : f32
    %cst_29 = arith.constant 1.000000e+00 : f32
    %96 = vector.broadcast %cst_28 : f32 to vector<8x128xf32>
    %97 = arith.maximumf %96, %95 : vector<8x128xf32>
    %98 = vector.broadcast %cst_29 : f32 to vector<8x128xf32>
    %99 = arith.minimumf %98, %97 : vector<8x128xf32>
    %c32 = arith.constant 32 : index
    %c0_30 = arith.constant 0 : index
    %100 = vector.load %arg4[%c32, %c0_30] : memref<64x128xf32, #tpu.memory_space<vmem>>, vector<8x128xf32>
    tpu.vector_store %arg4[%c32, %c0_30], %99 {strides = array<i32>} : memref<64x128xf32, #tpu.memory_space<vmem>>, vector<8x128xf32>,
    %c5_31 = arith.constant 5 : index
    %c0_32 = arith.constant 0 : index
    %101 = vector.load %arg3[%c5_31, %c0_32] : memref<8x128xf32, #tpu.memory_space<vmem>>, vector<1x128xf32>
    %c15 = arith.constant 15 : index
    %102 = memref.load %arg0[%c15] : memref<24xf32, #tpu.memory_space<smem>>
    %103 = vector.broadcast %102 : f32 to vector<8x128xf32>
    %104 = arith.mulf %103, %3 : vector<8x128xf32>
    %105 = vector.broadcast %101 : vector<1x128xf32> to vector<8x128xf32>
    %106 = arith.addf %105, %104 : vector<8x128xf32>
    %c16_33 = arith.constant 16 : index
    %107 = memref.load %arg0[%c16_33] : memref<24xf32, #tpu.memory_space<smem>>
    %108 = vector.broadcast %107 : f32 to vector<8x128xf32>
    %109 = arith.mulf %108, %4 : vector<8x128xf32>
    %110 = arith.addf %106, %109 : vector<8x128xf32>
    %c17 = arith.constant 17 : index
    %111 = memref.load %arg0[%c17] : memref<24xf32, #tpu.memory_space<smem>>
    %112 = vector.broadcast %111 : f32 to vector<8x128xf32>
    %113 = arith.mulf %112, %5 : vector<8x128xf32>
    %114 = arith.addf %110, %113 : vector<8x128xf32>
    %cst_34 = arith.constant 0.000000e+00 : f32
    %cst_35 = arith.constant 1.000000e+00 : f32
    %115 = vector.broadcast %cst_34 : f32 to vector<8x128xf32>
    %116 = arith.maximumf %115, %114 : vector<8x128xf32>
    %117 = vector.broadcast %cst_35 : f32 to vector<8x128xf32>
    %118 = arith.minimumf %117, %116 : vector<8x128xf32>
    %c40 = arith.constant 40 : index
    %c0_36 = arith.constant 0 : index
    %119 = vector.load %arg4[%c40, %c0_36] : memref<64x128xf32, #tpu.memory_space<vmem>>, vector<8x128xf32>
    tpu.vector_store %arg4[%c40, %c0_36], %118 {strides = array<i32>} : memref<64x128xf32, #tpu.memory_space<vmem>>, vector<8x128xf32>,
    %c6_37 = arith.constant 6 : index
    %c0_38 = arith.constant 0 : index
    %120 = vector.load %arg3[%c6_37, %c0_38] : memref<8x128xf32, #tpu.memory_space<vmem>>, vector<1x128xf32>
    %c18 = arith.constant 18 : index
    %121 = memref.load %arg0[%c18] : memref<24xf32, #tpu.memory_space<smem>>
    %122 = vector.broadcast %121 : f32 to vector<8x128xf32>
    %123 = arith.mulf %122, %3 : vector<8x128xf32>
    %124 = vector.broadcast %120 : vector<1x128xf32> to vector<8x128xf32>
    %125 = arith.addf %124, %123 : vector<8x128xf32>
    %c19 = arith.constant 19 : index
    %126 = memref.load %arg0[%c19] : memref<24xf32, #tpu.memory_space<smem>>
    %127 = vector.broadcast %126 : f32 to vector<8x128xf32>
    %128 = arith.mulf %127, %4 : vector<8x128xf32>
    %129 = arith.addf %125, %128 : vector<8x128xf32>
    %c20 = arith.constant 20 : index
    %130 = memref.load %arg0[%c20] : memref<24xf32, #tpu.memory_space<smem>>
    %131 = vector.broadcast %130 : f32 to vector<8x128xf32>
    %132 = arith.mulf %131, %5 : vector<8x128xf32>
    %133 = arith.addf %129, %132 : vector<8x128xf32>
    %cst_39 = arith.constant 0.000000e+00 : f32
    %cst_40 = arith.constant 1.000000e+00 : f32
    %134 = vector.broadcast %cst_39 : f32 to vector<8x128xf32>
    %135 = arith.maximumf %134, %133 : vector<8x128xf32>
    %136 = vector.broadcast %cst_40 : f32 to vector<8x128xf32>
    %137 = arith.minimumf %136, %135 : vector<8x128xf32>
    %c48 = arith.constant 48 : index
    %c0_41 = arith.constant 0 : index
    %138 = vector.load %arg4[%c48, %c0_41] : memref<64x128xf32, #tpu.memory_space<vmem>>, vector<8x128xf32>
    tpu.vector_store %arg4[%c48, %c0_41], %137 {strides = array<i32>} : memref<64x128xf32, #tpu.memory_space<vmem>>, vector<8x128xf32>,
    %c7_42 = arith.constant 7 : index
    %c0_43 = arith.constant 0 : index
    %139 = vector.load %arg3[%c7_42, %c0_43] : memref<8x128xf32, #tpu.memory_space<vmem>>, vector<1x128xf32>
    %c21 = arith.constant 21 : index
    %140 = memref.load %arg0[%c21] : memref<24xf32, #tpu.memory_space<smem>>
    %141 = vector.broadcast %140 : f32 to vector<8x128xf32>
    %142 = arith.mulf %141, %3 : vector<8x128xf32>
    %143 = vector.broadcast %139 : vector<1x128xf32> to vector<8x128xf32>
    %144 = arith.addf %143, %142 : vector<8x128xf32>
    %c22 = arith.constant 22 : index
    %145 = memref.load %arg0[%c22] : memref<24xf32, #tpu.memory_space<smem>>
    %146 = vector.broadcast %145 : f32 to vector<8x128xf32>
    %147 = arith.mulf %146, %4 : vector<8x128xf32>
    %148 = arith.addf %144, %147 : vector<8x128xf32>
    %c23 = arith.constant 23 : index
    %149 = memref.load %arg0[%c23] : memref<24xf32, #tpu.memory_space<smem>>
    %150 = vector.broadcast %149 : f32 to vector<8x128xf32>
    %151 = arith.mulf %150, %5 : vector<8x128xf32>
    %152 = arith.addf %148, %151 : vector<8x128xf32>
    %cst_44 = arith.constant 0.000000e+00 : f32
    %cst_45 = arith.constant 1.000000e+00 : f32
    %153 = vector.broadcast %cst_44 : f32 to vector<8x128xf32>
    %154 = arith.maximumf %153, %152 : vector<8x128xf32>
    %155 = vector.broadcast %cst_45 : f32 to vector<8x128xf32>
    %156 = arith.minimumf %155, %154 : vector<8x128xf32>
    %c56 = arith.constant 56 : index
    %c0_46 = arith.constant 0 : index
    %157 = vector.load %arg4[%c56, %c0_46] : memref<64x128xf32, #tpu.memory_space<vmem>>, vector<8x128xf32>
    tpu.vector_store %arg4[%c56, %c0_46], %156 {strides = array<i32>} : memref<64x128xf32, #tpu.memory_space<vmem>>, vector<8x128xf32>,
    return
  }
}

</mosaic_0001>

<bundles_post_ra>
// kernel: model_forward.1
= control target key start
LH: loop header
LB: loop body
LE: loop exit
PB: predicated region body
PF: predicated region fallthrough
CT: control target
= control target key end

     0   :  { %9 = vsyncpa [#allocation4], 0  ;;  %s742_s0 = inlined_call_operand.vmem [shape: f32[24], index: 0, kind: input, shape index: {}]   ;;  %s743_s1 = inlined_call_operand.vmem [shape: f32[24,256], index: 1, kind: input, shape index: {}]   ;;  %s744_s2 = inlined_call_operand.vmem [shape: f32[256,128], index: 2, kind: input, shape index: {}]   ;;  %s745_s3 = inlined_call_operand.vmem [shape: f32[8,128], index: 3, kind: input, shape index: {}]   ;;  %s746_s4 = inlined_call_operand.hbm [shape: f32[64,128], index: 4, kind: output, shape index: {}]  }
   0x1   :  { %10 = vsyncpa [#allocation3], 0  ;;  %s17_s17 = sshll.u32 %s742_s0, 4  ;;  %s18_s17 = int_to_ptr.vmem [resolvable:$true] %s17_s17 }
   0x2   :  { %s450_s18 = scalar_lea.vmem %s18_s17, 16  ;;  %p455_p1 = scmp.lt.s32.totalorder %s18_s17, %s18_s17 }
   0x3   :  { %p451_p0 = scmp.ne.s32.totalorder %s18_s17, %s450_s18  ;;  %p456_p2 = scmp.lt.s32.totalorder %s450_s18, %s450_s18 }
   0x5   :  { %p457_p3 = por %p456_p2, %p455_p1 }
   0x7   :  { %p458_p4 = pnand %p457_p3, %p451_p0 }
   0x9   :  { %461 = shalt.err (!%p458_p4)
}
   0xa   :  { %s488_s19 = smov [#allocation2]  }
   0xb   :  { %20 = dma.vmem_to_smem %s18_s17, 16, %s488_s19, [#allocation4]  }
   0xc   :  { %484 = dma.done.wait [#allocation4], 16  }
   0xd   :  { %485 = vsyncadd [#allocation4], 4294967280 }
   0xe   :  { %30 = sfence }
   0xf   :  { %v53_v0 = vld [vmem:[%s744_s2 + $0x80] sm:$0xff]  ;;  %v54_v1 = vld [vmem:[%s744_s2 + $0x88] sm:$0xff]  ;;  %v55_v5 = vld [vmem:[%s744_s2 + $0x90] sm:$0xff]  ;;  %s634_s14 = sld [smem:[#allocation2]]  ;;  %s636_s15 = sld [smem:[#allocation2 + $0x3]] }
  0x10   :  { %v37_v2 = vld [vmem:[%s744_s2] sm:$0xff]  ;;  %v398_v3 = vpack.c.bf16 %v54_v1, %v53_v0  ;;  %v38_v4 = vld [vmem:[%s744_s2 + $0x8] sm:$0xff]  ;;  %v56_v6 = vld [vmem:[%s744_s2 + $0x98] sm:$0xff]  ;;  %s638_s16 = sld [smem:[#allocation2 + $0x6]]  ;;  %s640_s17 = sld [smem:[#allocation2 + $0x9]] }
  0x11   :  { %v400_v7 = vpack.c.bf16 %v38_v4, %v37_v2  ;;  %v402_v8 = vpack.c.bf16 %v56_v6, %v55_v5  ;;  %v39_v9 = vld [vmem:[%s744_s2 + $0x10] sm:$0xff]  ;;  %v40_v10 = vld [vmem:[%s744_s2 + $0x18] sm:$0xff]  ;;  %v57_v11 = vld [vmem:[%s744_s2 + $0xa0] sm:$0xff]  ;;  %s642_s18 = sld [smem:[#allocation2 + $0xc]]  ;;  %s644_s19 = sld [smem:[#allocation2 + $0xf]] }
  0x12   :  { %399 = vmatprep.subr.bf16.mxu0 %v398_v3  ;;  %430 = vmatprep.subr.bf16.mxu1 %v398_v3  ;;  %v58_v12 = vld [vmem:[%s744_s2 + $0xa8] sm:$0xff]  ;;  %v404_v13 = vpack.c.bf16 %v40_v10, %v39_v9  ;;  %v41_v15 = vld [vmem:[%s744_s2 + $0x20] sm:$0xff]  ;;  %v59_v17 = vld [vmem:[%s744_s2 + $0xb0] sm:$0xff]  ;;  %s646_s20 = sld [smem:[#allocation2 + $0x12]]  ;;  %s648_s21 = sld [smem:[#allocation2 + $0x15]] }
  0x13   :  { %401 = vmatpush3.bf16.msra.mxu0 %v400_v7  ;;  %438 = vmatpush3.bf16.msra.mxu1 %v400_v7  ;;  %v406_v14 = vpack.c.bf16 %v58_v12, %v57_v11  ;;  %v42_v16 = vld [vmem:[%s744_s2 + $0x28] sm:$0xff]  ;;  %v60_v18 = vld [vmem:[%s744_s2 + $0xb8] sm:$0xff]  ;;  %v43_v21 = vld [vmem:[%s744_s2 + $0x30] sm:$0xff]  ;;  %s650_s22 = sld [smem:[#allocation2 + $0x1]]  ;;  %s654_s23 = sld [smem:[#allocation2 + $0x7]] }
  0x14   :  { %403 = vmatprep.subr.bf16.mxu0 %v402_v8  ;;  %431 = vmatprep.subr.bf16.mxu1 %v402_v8  ;;  %v408_v19 = vpack.c.bf16 %v42_v16, %v41_v15  ;;  %v410_v20 = vpack.c.bf16 %v60_v18, %v59_v17  ;;  %v44_v22 = vld [vmem:[%s744_s2 + $0x38] sm:$0xff]  ;;  %v61_v23 = vld [vmem:[%s744_s2 + $0xc0] sm:$0xff]  ;;  %v62_v24 = vld [vmem:[%s744_s2 + $0xc8] sm:$0xff]  ;;  %s656_s0 = sld [smem:[#allocation2 + $0xa]]  ;;  %s658_s24 = sld [smem:[#allocation2 + $0xd]] }
  0x15   :  { %v32_v25 = vld [vmem:[%s743_s1 + $0x8] sm:$0xff]  ;;  %v34_v26 = vld [vmem:[%s743_s1 + $0x18] sm:$0xff]  ;;  %v412_v27 = vpack.c.bf16 %v44_v22, %v43_v21  ;;  %v414_v28 = vpack.c.bf16 %v62_v24, %v61_v23  ;;  %v45_v29 = vld [vmem:[%s744_s2 + $0x40] sm:$0xff]  ;;  %s660_s25 = sld [smem:[#allocation2 + $0x10]]  ;;  %s662_s26 = sld [smem:[#allocation2 + $0x13]]  ;;  %v151_v54 = vstv %s634_s14 }
  0x16   :  { %133 = vmatprep.mubr.f32.mxu0 %v32_v25  ;;  %v46_v30 = vld [vmem:[%s744_s2 + $0x48] sm:$0xff]  ;;  %v63_v31 = vld [vmem:[%s744_s2 + $0xd0] sm:$0xff]  ;;  %v64_v32 = vld [vmem:[%s744_s2 + $0xd8] sm:$0xff]  ;;  %138 = vmatprep.mubr.f32.mxu1 %v34_v26  ;;  %s664_s27 = sld [smem:[#allocation2 + $0x16]]  ;;  %s666_s28 = sld [smem:[#allocation2 + $0x2]]  ;;  %v171_v55 = vstv %s636_s15 }
  0x17   :  { %405 = vmatpush3.bf16.msra.mxu0 %v404_v13  ;;  %439 = vmatpush3.bf16.msra.mxu1 %v404_v13  ;;  %v416_v33 = vpack.c.bf16 %v46_v30, %v45_v29  ;;  %v418_v34 = vpack.c.bf16 %v64_v32, %v63_v31  ;;  %v47_v35 = vld [vmem:[%s744_s2 + $0x50] sm:$0xff]  ;;  %v48_v36 = vld [vmem:[%s744_s2 + $0x58] sm:$0xff]  ;;  %v65_v37 = vld [vmem:[%s744_s2 + $0xe0] sm:$0xff]  ;;  %s668_s29 = sld [smem:[#allocation2 + $0x5]]  ;;  %s670_s30 = sld [smem:[#allocation2 + $0x8]]  ;;  %v191_v56 = vstv %s638_s16 }
  0x18   :  { %407 = vmatprep.subr.bf16.mxu0 %v406_v14  ;;  %432 = vmatprep.subr.bf16.mxu1 %v406_v14  ;;  %v66_v38 = vld [vmem:[%s744_s2 + $0xe8] sm:$0xff]  ;;  %v420_v39 = vpack.c.bf16 %v48_v36, %v47_v35  ;;  %v49_v41 = vld [vmem:[%s744_s2 + $0x60] sm:$0xff]  ;;  %v67_v43 = vld [vmem:[%s744_s2 + $0xf0] sm:$0xff]  ;;  %s672_s5 = sld [smem:[#allocation2 + $0xb]]  ;;  %s674_s6 = sld [smem:[#allocation2 + $0xe]]  ;;  %v211_v57 = vstv %s640_s17 }
  0x19   :  { %v422_v40 = vpack.c.bf16 %v66_v38, %v65_v37  ;;  %v50_v42 = vld [vmem:[%s744_s2 + $0x68] sm:$0xff]  ;;  %v68_v44 = vld [vmem:[%s744_s2 + $0xf8] sm:$0xff]  ;;  %v51_v47 = vld [vmem:[%s744_s2 + $0x70] sm:$0xff]  ;;  %s676_s7 = sld [smem:[#allocation2 + $0x11]]  ;;  %s678_s8 = sld [smem:[#allocation2 + $0x14]]  ;;  %v231_v58 = vstv %s642_s18 }
  0x1a   :  { %v424_v45 = vpack.c.bf16 %v50_v42, %v49_v41  ;;  %v426_v46 = vpack.c.bf16 %v68_v44, %v67_v43  ;;  %v52_v48 = vld [vmem:[%s744_s2 + $0x78] sm:$0xff]  ;;  %v31_v50 = vld [vmem:[%s743_s1] sm:$0xff]  ;;  %v33_v51 = vld [vmem:[%s743_s1 + $0x10] sm:$0xff]  ;;  %s680_s9 = sld [smem:[#allocation2 + $0x17]]  ;;  %v251_v59 = vstv %s644_s19 }
  0x1b   :  { %409 = vmatpush3.bf16.msra.mxu0 %v408_v19  ;;  %440 = vmatpush3.bf16.msra.mxu1 %v408_v19  ;;  %v428_v49 = vpack.c.bf16 %v52_v48, %v51_v47  ;;  %v36_v52 = vld [vmem:[%s743_s1 + $0x28] sm:$0xff]  ;;  %v35_v53 = vld [vmem:[%s743_s1 + $0x20] sm:$0xff]  ;;  %s652_s1 = sld [smem:[#allocation2 + $0x4]]  ;;  %v271_v60 = vstv %s646_s20  ;;  %v291_v61 = vstv %s648_s21 }
  0x1c   :  { %411 = vmatprep.subr.bf16.mxu0 %v410_v20  ;;  %433 = vmatprep.subr.bf16.mxu1 %v410_v20  ;;  %v159_v62 = vstv %s650_s22  ;;  %v199_v2 = vstv %s654_s23  ;;  %v219_v3 = vstv %s656_s0  ;;  %v239_v4 = vstv %s658_s24 }
  0x1d   :  { %v259_v5 = vstv %s660_s25  ;;  %v326_v7 = vld [vmem:[%s745_s3] ss:$0 sm:$0xff]  ;;  %v330_v8 = vld [vmem:[%s745_s3 + $0x1] ss:$0 sm:$0xff]  ;;  %v334_v9 = vld [vmem:[%s745_s3 + $0x2] ss:$0 sm:$0xff] }
  0x1e   :  { %v338_v10 = vld [vmem:[%s745_s3 + $0x3] ss:$0 sm:$0xff]  ;;  %v279_v12 = vstv %s662_s26  ;;  %v299_v13 = vstv %s664_s27  ;;  %v163_v14 = vstv %s666_s28 }
  0x1f   :  { %413 = vmatpush3.bf16.msra.mxu0 %v412_v27  ;;  %441 = vmatpush3.bf16.msra.mxu1 %v412_v27  ;;  %v183_v15 = vstv %s668_s29  ;;  %v342_v17 = vld [vmem:[%s745_s3 + $0x4] ss:$0 sm:$0xff]  ;;  %v346_v18 = vld [vmem:[%s745_s3 + $0x5] ss:$0 sm:$0xff]  ;;  %v203_v20 = vstv %s670_s30 }
  0x20   :  { %415 = vmatprep.subr.bf16.mxu0 %v414_v28  ;;  %434 = vmatprep.subr.bf16.mxu1 %v414_v28  ;;  %v223_v21 = vstv %s672_s5  ;;  %v243_v22 = vstv %s674_s6  ;;  %v263_v23 = vstv %s676_s7  ;;  %v283_v24 = vstv %s678_s8 }
  0x21   :  { %v179_v63 = vstv %s652_s1  ;;  %v303_v25 = vstv %s680_s9  ;;  %v350_v30 = vld [vmem:[%s745_s3 + $0x6] ss:$0 sm:$0xff]  ;;  %v354_v31 = vld [vmem:[%s745_s3 + $0x7] ss:$0 sm:$0xff]  ;;  %s489_s3 = smov [#allocation5]  }
  0x22   :  { %s314_s0 = sshll.u32 %s489_s3, 4  ;;  %s315_s0 = int_to_ptr.vmem [resolvable:$true] %s314_s0 }
  0x23   :  { %417 = vmatpush3.bf16.msra.mxu0 %v416_v33  ;;  %442 = vmatpush3.bf16.msra.mxu1 %v416_v33  ;;  %s462_s24 = scalar_lea.vmem %s315_s0, 1024  ;;  %p467_p6 = scmp.lt.s32.totalorder %s315_s0, %s315_s0 }
  0x24   :  { %419 = vmatprep.subr.bf16.mxu0 %v418_v34  ;;  %435 = vmatprep.subr.bf16.mxu1 %v418_v34  ;;  %p463_p5 = scmp.ne.s32.totalorder %s315_s0, %s462_s24  ;;  %p468_p7 = scmp.lt.s32.totalorder %s462_s24, %s462_s24 }
  0x26   :  { %p469_p8 = por %p468_p7, %p467_p6 }
  0x27   :  { %421 = vmatpush3.bf16.msra.mxu0 %v420_v39  ;;  %443 = vmatpush3.bf16.msra.mxu1 %v420_v39 }
  0x28   :  { %423 = vmatprep.subr.bf16.mxu0 %v422_v40  ;;  %436 = vmatprep.subr.bf16.mxu1 %v422_v40  ;;  %p470_p9 = pnand %p469_p8, %p463_p5 }
  0x2b   :  { %425 = vmatpush3.bf16.msra.mxu0 %v424_v45  ;;  %444 = vmatpush3.bf16.msra.mxu1 %v424_v45 }
  0x2c   :  { %427 = vmatprep.subr.bf16.mxu0 %v426_v46  ;;  %437 = vmatprep.subr.bf16.mxu1 %v426_v46 }
  0x2f   :  { %429 = vmatpush3.bf16.msra.mxu0 %v428_v49  ;;  %445 = vmatpush3.bf16.msra.mxu1 %v428_v49 }
  0x32   :  { %134 = vmatmul.mubr.f32.vlgmr.msra.gmra.mrb[0].mxu0 %v31_v50  ;;  %139 = vmatmul.mubr.f32.vlgmr.msra.gmra.mrb[0].mxu1 %v33_v51 }
  0x33   :  { %143 = vmatprep.mubr.f32.mxu1 %v36_v52 }
  0x36   :  { %144 = vmatmul.mubr.f32.gmra.mrb[2].mxu1 %v35_v53 }
 0x105   :  { %v389_v0 = vpop.f32.mrb[0].mxu0  ;;  %v392_v1 = vpop.f32.mrb[0].mxu1 }
 0x106   :  { %v390_v6 = vpop.f32.mrb[1].mxu0  ;;  %v393_v11 = vpop.f32.mrb[1].mxu1 }
 0x107   :  { %v391_v16 = vadd.f32 %v390_v6, %v389_v0  ;;  %v394_v19 = vadd.f32 %v393_v11, %v392_v1 }
 0x109   :  { %v152_v26 = vmul.f32 %v391_v16, %v151_v54  ;;  %v172_v27 = vmul.f32 %v391_v16, %v171_v55  ;;  %v192_v28 = vmul.f32 %v391_v16, %v191_v56  ;;  %v212_v29 = vmul.f32 %v391_v16, %v211_v57  ;;  %v395_v32 = vpop.f32.mrb[2].mxu1 }
 0x10a   :  { %v232_v33 = vmul.f32 %v391_v16, %v231_v58  ;;  %v252_v34 = vmul.f32 %v391_v16, %v251_v59  ;;  %v272_v35 = vmul.f32 %v391_v16, %v271_v60  ;;  %v292_v36 = vmul.f32 %v391_v16, %v291_v61  ;;  %v396_v37 = vpop.f32.mrb[3].mxu1 }
 0x10b   :  { %v157_v38 = vadd.f32 %v326_v7, %v152_v26  ;;  %v177_v39 = vadd.f32 %v330_v8, %v172_v27  ;;  %v197_v40 = vadd.f32 %v334_v9, %v192_v28  ;;  %v217_v41 = vadd.f32 %v338_v10, %v212_v29 }
 0x10c   :  { %v237_v42 = vadd.f32 %v342_v17, %v232_v33  ;;  %v257_v43 = vadd.f32 %v346_v18, %v252_v34  ;;  %v277_v44 = vadd.f32 %v350_v30, %v272_v35  ;;  %v297_v45 = vadd.f32 %v354_v31, %v292_v36 }
 0x10d   :  { %v160_v46 = vmul.f32 %v394_v19, %v159_v62  ;;  %v180_v47 = vmul.f32 %v394_v19, %v179_v63  ;;  %v200_v48 = vmul.f32 %v394_v19, %v199_v2  ;;  %v220_v49 = vmul.f32 %v394_v19, %v219_v3 }
 0x10e   :  { %v240_v50 = vmul.f32 %v394_v19, %v239_v4  ;;  %v260_v51 = vmul.f32 %v394_v19, %v259_v5  ;;  %v280_v52 = vmul.f32 %v394_v19, %v279_v12  ;;  %v300_v53 = vmul.f32 %v394_v19, %v299_v13 }
 0x10f   :  { %v397_v54 = vadd.f32 %v396_v37, %v395_v32  ;;  %v161_v55 = vadd.f32 %v160_v46, %v157_v38  ;;  %v181_v56 = vadd.f32 %v180_v47, %v177_v39  ;;  %v201_v57 = vadd.f32 %v200_v48, %v197_v40 }
 0x110   :  { %v221_v58 = vadd.f32 %v220_v49, %v217_v41  ;;  %v241_v59 = vadd.f32 %v240_v50, %v237_v42  ;;  %v261_v60 = vadd.f32 %v260_v51, %v257_v43  ;;  %v281_v61 = vadd.f32 %v280_v52, %v277_v44 }
 0x111   :  { %v164_v0 = vmul.f32 %v397_v54, %v163_v14  ;;  %v184_v1 = vmul.f32 %v397_v54, %v183_v15  ;;  %v204_v6 = vmul.f32 %v397_v54, %v203_v20  ;;  %v224_v7 = vmul.f32 %v397_v54, %v223_v21 }
 0x112   :  { %v244_v62 = vmul.f32 %v397_v54, %v243_v22  ;;  %v264_v63 = vmul.f32 %v397_v54, %v263_v23  ;;  %v284_v2 = vmul.f32 %v397_v54, %v283_v24  ;;  %v304_v3 = vmul.f32 %v397_v54, %v303_v25 }
 0x113   :  { %v165_v4 = vadd.f32 %v164_v0, %v161_v55  ;;  %v185_v5 = vadd.f32 %v184_v1, %v181_v56  ;;  %v205_v8 = vadd.f32 %v204_v6, %v201_v57  ;;  %v225_v9 = vadd.f32 %v224_v7, %v221_v58 }
 0x114   :  { %v245_v10 = vadd.f32 %v244_v62, %v241_v59  ;;  %v265_v11 = vadd.f32 %v264_v63, %v261_v60  ;;  %v285_v12 = vadd.f32 %v284_v2, %v281_v61  ;;  %v301_v13 = vadd.f32 %v300_v53, %v297_v45 }
 0x115   :  { %v166_v16 = vmax.f32 %v165_v4, 0.0  ;;  %v186_v17 = vmax.f32 %v185_v5, 0.0  ;;  %v206_v18 = vmax.f32 %v205_v8, 0.0  ;;  %v226_v19 = vmax.f32 %v225_v9, 0.0 }
 0x116   :  { %v246_v14 = vmax.f32 %v245_v10, 0.0  ;;  %v266_v15 = vmax.f32 %v265_v11, 0.0  ;;  %v286_v20 = vmax.f32 %v285_v12, 0.0  ;;  %v305_v21 = vadd.f32 %v304_v3, %v301_v13 }
 0x117   :  { %v167_v22 = vmin.f32 %v166_v16, 1.0  ;;  %v187_v23 = vmin.f32 %v186_v17, 1.0  ;;  %v207_v24 = vmin.f32 %v206_v18, 1.0  ;;  %v227_v25 = vmin.f32 %v226_v19, 1.0 }
 0x118   :  { %v247_v26 = vmin.f32 %v246_v14, 1.0  ;;  %v267_v27 = vmin.f32 %v266_v15, 1.0  ;;  %v287_v28 = vmin.f32 %v286_v20, 1.0  ;;  %v306_v29 = vmax.f32 %v305_v21, 0.0 }
 0x119   :  { %168 = vst [vmem:[#allocation5] sm:$0xff] %v167_v22  ;;  %188 = vst [vmem:[#allocation5 + $0x8] sm:$0xff] %v187_v23 }
 0x11a   :  { %208 = vst [vmem:[#allocation5 + $0x10] sm:$0xff] %v207_v24  ;;  %228 = vst [vmem:[#allocation5 + $0x18] sm:$0xff] %v227_v25  ;;  %v307_v30 = vmin.f32 %v306_v29, 1.0 }
 0x11b   :  { %248 = vst [vmem:[#allocation5 + $0x20] sm:$0xff] %v247_v26  ;;  %268 = vst [vmem:[#allocation5 + $0x28] sm:$0xff] %v267_v27 }
 0x11c   :  { %288 = vst [vmem:[#allocation5 + $0x30] sm:$0xff] %v287_v28  ;;  %308 = vst [vmem:[#allocation5 + $0x38] sm:$0xff] %v307_v30 }
 0x11d   :  { %473 = shalt.err (!%p470_p9)
}
 0x11e   :  { %s474_s27 = scalar_lea.hbm %s746_s4, 1024 }
 0x11f   :  { %p475_p10 = scmp.ne.s32.totalorder %s746_s4, %s474_s27  ;;  %p478_p11 = scmp.lt.u32.totalorder %s474_s27, %s746_s4 }
 0x121   :  { %p480_p12 = pnand %p478_p11, %p475_p10 }
 0x123   :  { %483 = shalt.err (!%p480_p12)
}
 0x124   :  { %s490_s6 = smov 128   ;;  %s491_s7 = smov 8  }
 0x125   :  { %320 = dma.vmem_to_hbm [thread:$0]  %s315_s0, 1024, %s746_s4, [#allocation3], %s490_s6, %s490_s6, %s491_s7  }
 0x126   :  { %486 = dma.done.wait [#allocation3], 1024  }
 0x127   :  { %487 = vsyncadd [#allocation3], 4294966272 }
 0x128   :  { %324 = vsyncpa [#allocation3], 1 }
 0x129   :  { %325 = vsyncpa [#allocation4], 1 }

</bundles_post_ra>
